<compile_context>
chip_gen: v7x
topology: tpu7x:2x2x1
jax: 0.10.0
libtpu: 0.0.40
codegen_flags: <defaults>
</compile_context>

<pallas_src>
import numpy as np
import jax
import jax.numpy as jnp
from jax.experimental import pallas as pl
from jax.experimental.pallas import tpu as pltpu


# ----------------------------- kernel -----------------------------------------
def _make_basic_block_kernel(H, W, Cin, Cout, use_residual, needs_proj):
    WCin, WCout = W * Cin, W * Cout

    def kernel(x_ref, w1_ref, s1_ref, b1_ref, w2_ref, s2_ref, b2_ref, *rest):
        if needs_proj:
            wsc_ref, ssc_ref, bsc_ref, out_ref, xh_ref, y1h_ref = rest
        else:
            out_ref, xh_ref, y1h_ref = rest
            wsc_ref = ssc_ref = bsc_ref = None

        x = x_ref[0]                                            # (H, W*Cin)

        # ---- stage x with a zero H-halo (W halo is folded into the banded
        #      weights, so no W padding is needed anywhere) ------------------
        zrow_in = jnp.zeros((1, WCin), jnp.float32)
        xh_ref[0:1, :] = zrow_in
        xh_ref[H + 1:H + 2, :] = zrow_in
        xh_ref[1:H + 1, :] = x

        # ---- conv1 (3x3, pad=1) + bn1 + relu: 3 row-slab matmuls -----------
        acc1 = jnp.zeros((H, WCout), jnp.float32)
        for dy in range(3):
            acc1 = acc1 + jnp.dot(xh_ref[dy:dy + H, :], w1_ref[dy],
                                  preferred_element_type=jnp.float32)
        y1 = jnp.maximum(acc1 * s1_ref[...] + b1_ref[...], 0.0)  # (H, W*Cout)

        # ---- stage y1 with a zero H-halo ------------------------------------
        zrow_out = jnp.zeros((1, WCout), jnp.float32)
        y1h_ref[0:1, :] = zrow_out
        y1h_ref[H + 1:H + 2, :] = zrow_out
        y1h_ref[1:H + 1, :] = y1

        # ---- conv2 (3x3, pad=1) + bn2 ---------------------------------------
        acc2 = jnp.zeros((H, WCout), jnp.float32)
        for dy in range(3):
            acc2 = acc2 + jnp.dot(y1h_ref[dy:dy + H, :], w2_ref[dy],
                                  preferred_element_type=jnp.float32)
        out = acc2 * s2_ref[...] + b2_ref[...]

        # ---- residual --------------------------------------------------------
        if use_residual:
            if needs_proj:
                sc = jnp.dot(x, wsc_ref[...],
                             preferred_element_type=jnp.float32)
                sc = sc * ssc_ref[...] + bsc_ref[...]
            else:
                sc = x                       # identity (Cin == Cout), lane-dense
            out = out + sc

        # ---- final relu, lane-dense store (W*Cout = 128 in the demo) --------
        out_ref[0] = jnp.maximum(out, 0.0)

    return kernel


# ----------------------------- wrapper-side weight prep ------------------------
def _fold_bn(gamma, beta, mean, var, eps=1e-5):
    scale = (gamma / jnp.sqrt(var + eps)).astype(jnp.float32)
    bias = (beta - mean * scale).astype(jnp.float32)
    return scale, bias                                     # each (C,)


def _lane_tile(v, W):
    # (C,) -> (1, W*C) with element [0, w*C + c] = v[c]
    return jnp.tile(v, W).reshape(1, -1).astype(jnp.float32)


def _band_weights(w_hwio, W):
    # w_hwio: (3, 3, Cin, Cout).  Returns (3, W*Cin, W*Cout): for each dy a
    # matrix mapping a lane-dense unpadded input row (W*Cin,) to a lane-dense
    # output row (W*Cout,), with the 3 dx taps and the W-direction zero
    # padding folded in:
    #   M[dy][wx*Cin+ci, w*Cout+co] = w[dy, wx-w+1, ci, co] if 0 <= wx-w+1 < 3
    kH, kW, Cin, Cout = w_hwio.shape
    band = np.zeros((kW, W, W), np.float32)                # band[dx, wx, w]
    for dx in range(kW):
        for w in range(W):
            wx = w + dx - 1
            if 0 <= wx < W:
                band[dx, wx, w] = 1.0
    band = jnp.asarray(band)
    m = jnp.einsum('dxw,ydio->yxiwo', band, w_hwio.astype(jnp.float32))
    return m.reshape(kH, W * Cin, W * Cout)


def _blockdiag_weight(wsc, W):
    # wsc: (Cin, Cout) 1x1-conv weight -> (W*Cin, W*Cout) block-diagonal matrix
    Cin, Cout = wsc.shape
    eye = jnp.eye(W, dtype=jnp.float32)
    m = jnp.einsum('xw,io->xiwo', eye, wsc.astype(jnp.float32))
    return m.reshape(W * Cin, W * Cout)


# ----------------------------- forward ----------------------------------------
def basic_block_forward(x_nchw, params, *, use_residual=True, stride=1):
    """Pallas BasicBlock forward.  x_nchw: (N, Cin, H, W) f32 -> (N, Cout, H, W)."""
    assert stride == 1, "stride > 1 not implemented in this kernel"
    N, Cin, H, W = x_nchw.shape
    Cout = params["w1"].shape[-1]
    needs_proj = bool(use_residual and (Cin != Cout))
    WCin, WCout = W * Cin, W * Cout

    # NHWC, lane-dense rows (glue only; no padded HBM copy of the activation).
    x = jnp.transpose(x_nchw, (0, 2, 3, 1)).astype(jnp.float32).reshape(N, H, WCin)

    w1b = _band_weights(params["w1"], W)                   # (3, W*Cin,  W*Cout)
    w2b = _band_weights(params["w2"], W)                   # (3, W*Cout, W*Cout)
    s1, b1 = _fold_bn(params["g1"], params["be1"], params["m1"], params["v1"])
    s2, b2 = _fold_bn(params["g2"], params["be2"], params["m2"], params["v2"])
    s1t, b1t = _lane_tile(s1, W), _lane_tile(b1, W)
    s2t, b2t = _lane_tile(s2, W), _lane_tile(b2, W)

    def full_spec(shape):
        nd = len(shape)
        return pl.BlockSpec(shape, lambda n, _nd=nd: (0,) * _nd)

    in_arrays = [x, w1b, s1t, b1t, w2b, s2t, b2t]
    in_specs = [
        pl.BlockSpec((1, H, WCin), lambda n: (n, 0, 0)),
        full_spec((3, WCin, WCout)),
        full_spec((1, WCout)), full_spec((1, WCout)),
        full_spec((3, WCout, WCout)),
        full_spec((1, WCout)), full_spec((1, WCout)),
    ]
    if needs_proj:
        wscb = _blockdiag_weight(params["wsc"], W)         # (W*Cin, W*Cout)
        ssc, bsc = _fold_bn(params["gsc"], params["besc"],
                            params["msc"], params["vsc"])
        in_arrays += [wscb, _lane_tile(ssc, W), _lane_tile(bsc, W)]
        in_specs += [full_spec((WCin, WCout)),
                     full_spec((1, WCout)), full_spec((1, WCout))]

    kernel = _make_basic_block_kernel(H, W, Cin, Cout, use_residual, needs_proj)

    out_flat = pl.pallas_call(
        kernel,
        out_shape=jax.ShapeDtypeStruct((N, H, WCout), jnp.float32),
        grid_spec=pltpu.PrefetchScalarGridSpec(
            num_scalar_prefetch=0,
            grid=(N,),                                     # one image per step
            in_specs=in_specs,
            out_specs=pl.BlockSpec((1, H, WCout), lambda n: (n, 0, 0)),
            scratch_shapes=[pltpu.VMEM((H + 2, WCin), jnp.float32),   # x + H halo
                            pltpu.VMEM((H + 2, WCout), jnp.float32)], # y1 + H halo
        ),
        compiler_params=pltpu.CompilerParams(
            dimension_semantics=("parallel",),             # v7x: 2 TensorCores
            vmem_limit_bytes=32 * 1024 * 1024),
    )(*in_arrays)

    out_nhwc = out_flat.reshape(N, H, W, Cout)
    return jnp.transpose(out_nhwc, (0, 3, 1, 2))           # back to NCHW


# ----------------------------- pure-JAX reference ------------------------------
def _reference(x_nchw, params, use_residual=True):
    x = jnp.transpose(x_nchw, (0, 2, 3, 1)).astype(jnp.float32)

    def conv(y, w, pad):
        return jax.lax.conv_general_dilated(
            y, w, (1, 1), ((pad, pad), (pad, pad)),
            dimension_numbers=("NHWC", "HWIO", "NHWC"))

    def bn(y, g, b, m, v, eps=1e-5):
        return (y - m) / jnp.sqrt(v + eps) * g + b

    y = jax.nn.relu(bn(conv(x, params["w1"], 1),
                       params["g1"], params["be1"], params["m1"], params["v1"]))
    y = bn(conv(y, params["w2"], 1),
           params["g2"], params["be2"], params["m2"], params["v2"])
    if use_residual:
        Cin, Cout = x.shape[-1], y.shape[-1]
        if Cin != Cout:
            sc = conv(x, params["wsc"][None, None], 0)
            sc = bn(sc, params["gsc"], params["besc"], params["msc"], params["vsc"])
        else:
            sc = x
        y = y + sc
    return jnp.transpose(jax.nn.relu(y), (0, 3, 1, 2))


if __name__ == "__main__":
    # BasicBlock(in_planes=4, planes=8, stride=1, use_residual=True)
    # -> shortcut is a 1x1 conv + BN (since in_planes != planes).
    N, Cin, Cout, H, W = 2, 4, 8, 16, 16

    key = jax.random.PRNGKey(0)
    k1, k2, k3, kx = jax.random.split(key, 4)

    def bn_params(prefix, c):
        ar = jnp.arange(c, dtype=jnp.float32)
        return {
            f"g{prefix}": 1.0 + 0.10 * ar,
            f"be{prefix}": 0.02 * ar,
            f"m{prefix}": 0.01 * ar,
            f"v{prefix}": 1.0 + 0.05 * ar,
        }

    params = {
        "w1": 0.1 * jax.random.normal(k1, (3, 3, Cin, Cout), jnp.float32),
        "w2": 0.1 * jax.random.normal(k2, (3, 3, Cout, Cout), jnp.float32),
        "wsc": 0.1 * jax.random.normal(k3, (Cin, Cout), jnp.float32),
    }
    params.update(bn_params("1", Cout))
    params.update(bn_params("2", Cout))
    params.update(bn_params("sc", Cout))

    x = jax.random.normal(kx, (N, Cin, H, W), jnp.float32)

    out = basic_block_forward(x, params, use_residual=True, stride=1)
    out = jax.block_until_ready(out)

    ref = _reference(x, params, use_residual=True)
    assert out.shape == (N, Cout, H, W), out.shape
    max_err = float(jnp.max(jnp.abs(out - ref)))
    if max_err > 1e-3:
        raise SystemExit(f"MISMATCH: max abs err = {max_err}")
    print("KERNEL_OK")
</pallas_src>

<mosaic_0001>
module attributes {stable_mosaic.version = 11 : i64} {
  func.func @kernel(%arg0: i32, %arg1: memref<1x16x64xf32, #tpu.memory_space<vmem>>, %arg2: memref<3x64x128xf32, #tpu.memory_space<vmem>>, %arg3: memref<1x128xf32, #tpu.memory_space<vmem>>, %arg4: memref<1x128xf32, #tpu.memory_space<vmem>>, %arg5: memref<3x128x128xf32, #tpu.memory_space<vmem>>, %arg6: memref<1x128xf32, #tpu.memory_space<vmem>>, %arg7: memref<1x128xf32, #tpu.memory_space<vmem>>, %arg8: memref<64x128xf32, #tpu.memory_space<vmem>>, %arg9: memref<1x128xf32, #tpu.memory_space<vmem>>, %arg10: memref<1x128xf32, #tpu.memory_space<vmem>>, %arg11: memref<1x16x128xf32, #tpu.memory_space<vmem>>, %arg12: memref<18x64xf32, #tpu.memory_space<vmem>>, %arg13: memref<18x128xf32, #tpu.memory_space<vmem>>) attributes {dimension_semantics = [#tpu.dimension_semantics<parallel>], iteration_bounds = array<i64: 2>, scalar_prefetch = 0 : i64, scratch_operands = 2 : i64, tpu.core_type = #tpu.core_type<tc>, window_params = [{transform_indices = @transform_0, window_bounds = array<i64: 1, 16, 64>}, {pipeline_mode = #tpu.pipeline_mode<synchronous>, transform_indices = @transform_1, window_bounds = array<i64: 3, 64, 128>}, {pipeline_mode = #tpu.pipeline_mode<synchronous>, transform_indices = @transform_2, window_bounds = array<i64: 1, 128>}, {pipeline_mode = #tpu.pipeline_mode<synchronous>, transform_indices = @transform_3, window_bounds = array<i64: 1, 128>}, {pipeline_mode = #tpu.pipeline_mode<synchronous>, transform_indices = @transform_4, window_bounds = array<i64: 3, 128, 128>}, {pipeline_mode = #tpu.pipeline_mode<synchronous>, transform_indices = @transform_5, window_bounds = array<i64: 1, 128>}, {pipeline_mode = #tpu.pipeline_mode<synchronous>, transform_indices = @transform_6, window_bounds = array<i64: 1, 128>}, {pipeline_mode = #tpu.pipeline_mode<synchronous>, transform_indices = @transform_7, window_bounds = array<i64: 64, 128>}, {pipeline_mode = #tpu.pipeline_mode<synchronous>, transform_indices = @transform_8, window_bounds = array<i64: 1, 128>}, {pipeline_mode = #tpu.pipeline_mode<synchronous>, transform_indices = @transform_9, window_bounds = array<i64: 1, 128>}, {transform_indices = @transform_10, window_bounds = array<i64: 1, 16, 128>}]} {
    %c0 = arith.constant 0 : index
    %c0_0 = arith.constant 0 : index
    %c0_1 = arith.constant 0 : index
    %0 = vector.load %arg1[%c0, %c0_0, %c0_1] : memref<1x16x64xf32, #tpu.memory_space<vmem>>, vector<1x16x64xf32>
    %1 = vector.shape_cast %0 : vector<1x16x64xf32> to vector<16x64xf32>
    %cst = arith.constant 0.000000e+00 : f32
    %2 = vector.broadcast %cst : f32 to vector<1x64xf32>
    %c0_2 = arith.constant 0 : index
    %c0_3 = arith.constant 0 : index
    %3 = vector.load %arg12[%c0_2, %c0_3] : memref<18x64xf32, #tpu.memory_space<vmem>>, vector<1x64xf32>
    tpu.vector_store %arg12[%c0_2, %c0_3], %2 {strides = array<i32>} : memref<18x64xf32, #tpu.memory_space<vmem>>, vector<1x64xf32>,
    %c17 = arith.constant 17 : index
    %c0_4 = arith.constant 0 : index
    %4 = vector.load %arg12[%c17, %c0_4] : memref<18x64xf32, #tpu.memory_space<vmem>>, vector<1x64xf32>
    tpu.vector_store %arg12[%c17, %c0_4], %2 {strides = array<i32>} : memref<18x64xf32, #tpu.memory_space<vmem>>, vector<1x64xf32>,
    %c1 = arith.constant 1 : index
    %c0_5 = arith.constant 0 : index
    %5 = vector.load %arg12[%c1, %c0_5] : memref<18x64xf32, #tpu.memory_space<vmem>>, vector<16x64xf32>
    tpu.vector_store %arg12[%c1, %c0_5], %1 {strides = array<i32>} : memref<18x64xf32, #tpu.memory_space<vmem>>, vector<16x64xf32>,
    %cst_6 = arith.constant 0.000000e+00 : f32
    %6 = vector.broadcast %cst_6 : f32 to vector<16x128xf32>
    %c0_7 = arith.constant 0 : index
    %c0_8 = arith.constant 0 : index
    %7 = vector.load %arg12[%c0_7, %c0_8] : memref<18x64xf32, #tpu.memory_space<vmem>>, vector<16x64xf32>
    %c0_9 = arith.constant 0 : index
    %c0_10 = arith.constant 0 : index
    %c0_11 = arith.constant 0 : index
    %8 = vector.load %arg2[%c0_9, %c0_10, %c0_11] : memref<3x64x128xf32, #tpu.memory_space<vmem>>, vector<1x64x128xf32>
    %9 = vector.shape_cast %8 : vector<1x64x128xf32> to vector<64x128xf32>
    %cst_12 = arith.constant dense<0.000000e+00> : vector<16x128xf32>
    %10 = tpu.matmul %7, %9, %cst_12 {dimension_numbers = #tpu.dot_dimension_numbers<[1], [0], [0], [1], [0, 0, 1, 1], [], []>} : vector<16x64xf32>, vector<64x128xf32>, vector<16x128xf32> -> vector<16x128xf32>
    %11 = arith.addf %6, %10 : vector<16x128xf32>
    %c1_13 = arith.constant 1 : index
    %c0_14 = arith.constant 0 : index
    %12 = vector.load %arg12[%c1_13, %c0_14] : memref<18x64xf32, #tpu.memory_space<vmem>>, vector<16x64xf32>
    %c1_15 = arith.constant 1 : index
    %c0_16 = arith.constant 0 : index
    %c0_17 = arith.constant 0 : index
    %13 = vector.load %arg2[%c1_15, %c0_16, %c0_17] : memref<3x64x128xf32, #tpu.memory_space<vmem>>, vector<1x64x128xf32>
    %14 = vector.shape_cast %13 : vector<1x64x128xf32> to vector<64x128xf32>
    %cst_18 = arith.constant dense<0.000000e+00> : vector<16x128xf32>
    %15 = tpu.matmul %12, %14, %cst_18 {dimension_numbers = #tpu.dot_dimension_numbers<[1], [0], [0], [1], [0, 0, 1, 1], [], []>} : vector<16x64xf32>, vector<64x128xf32>, vector<16x128xf32> -> vector<16x128xf32>
    %16 = arith.addf %11, %15 : vector<16x128xf32>
    %c2 = arith.constant 2 : index
    %c0_19 = arith.constant 0 : index
    %17 = vector.load %arg12[%c2, %c0_19] : memref<18x64xf32, #tpu.memory_space<vmem>>, vector<16x64xf32>
    %c2_20 = arith.constant 2 : index
    %c0_21 = arith.constant 0 : index
    %c0_22 = arith.constant 0 : index
    %18 = vector.load %arg2[%c2_20, %c0_21, %c0_22] : memref<3x64x128xf32, #tpu.memory_space<vmem>>, vector<1x64x128xf32>
    %19 = vector.shape_cast %18 : vector<1x64x128xf32> to vector<64x128xf32>
    %cst_23 = arith.constant dense<0.000000e+00> : vector<16x128xf32>
    %20 = tpu.matmul %17, %19, %cst_23 {dimension_numbers = #tpu.dot_dimension_numbers<[1], [0], [0], [1], [0, 0, 1, 1], [], []>} : vector<16x64xf32>, vector<64x128xf32>, vector<16x128xf32> -> vector<16x128xf32>
    %21 = arith.addf %16, %20 : vector<16x128xf32>
    %c0_24 = arith.constant 0 : index
    %c0_25 = arith.constant 0 : index
    %22 = vector.load %arg3[%c0_24, %c0_25] : memref<1x128xf32, #tpu.memory_space<vmem>>, vector<1x128xf32>
    %23 = vector.broadcast %22 : vector<1x128xf32> to vector<16x128xf32>
    %24 = arith.mulf %21, %23 : vector<16x128xf32>
    %c0_26 = arith.constant 0 : index
    %c0_27 = arith.constant 0 : index
    %25 = vector.load %arg4[%c0_26, %c0_27] : memref<1x128xf32, #tpu.memory_space<vmem>>, vector<1x128xf32>
    %26 = vector.broadcast %25 : vector<1x128xf32> to vector<16x128xf32>
    %27 = arith.addf %24, %26 : vector<16x128xf32>
    %cst_28 = arith.constant 0.000000e+00 : f32
    %28 = vector.broadcast %cst_28 : f32 to vector<16x128xf32>
    %29 = arith.maximumf %27, %28 : vector<16x128xf32>
    %cst_29 = arith.constant 0.000000e+00 : f32
    %30 = vector.broadcast %cst_29 : f32 to vector<1x128xf32>
    %c0_30 = arith.constant 0 : index
    %c0_31 = arith.constant 0 : index
    %31 = vector.load %arg13[%c0_30, %c0_31] : memref<18x128xf32, #tpu.memory_space<vmem>>, vector<1x128xf32>
    tpu.vector_store %arg13[%c0_30, %c0_31], %30 {strides = array<i32>} : memref<18x128xf32, #tpu.memory_space<vmem>>, vector<1x128xf32>,
    %c17_32 = arith.constant 17 : index
    %c0_33 = arith.constant 0 : index
    %32 = vector.load %arg13[%c17_32, %c0_33] : memref<18x128xf32, #tpu.memory_space<vmem>>, vector<1x128xf32>
    tpu.vector_store %arg13[%c17_32, %c0_33], %30 {strides = array<i32>} : memref<18x128xf32, #tpu.memory_space<vmem>>, vector<1x128xf32>,
    %c1_34 = arith.constant 1 : index
    %c0_35 = arith.constant 0 : index
    %33 = vector.load %arg13[%c1_34, %c0_35] : memref<18x128xf32, #tpu.memory_space<vmem>>, vector<16x128xf32>
    tpu.vector_store %arg13[%c1_34, %c0_35], %29 {strides = array<i32>} : memref<18x128xf32, #tpu.memory_space<vmem>>, vector<16x128xf32>,
    %cst_36 = arith.constant 0.000000e+00 : f32
    %34 = vector.broadcast %cst_36 : f32 to vector<16x128xf32>
    %c0_37 = arith.constant 0 : index
    %c0_38 = arith.constant 0 : index
    %35 = vector.load %arg13[%c0_37, %c0_38] : memref<18x128xf32, #tpu.memory_space<vmem>>, vector<16x128xf32>
    %c0_39 = arith.constant 0 : index
    %c0_40 = arith.constant 0 : index
    %c0_41 = arith.constant 0 : index
    %36 = vector.load %arg5[%c0_39, %c0_40, %c0_41] : memref<3x128x128xf32, #tpu.memory_space<vmem>>, vector<1x128x128xf32>
    %37 = vector.shape_cast %36 : vector<1x128x128xf32> to vector<128x128xf32>
    %cst_42 = arith.constant dense<0.000000e+00> : vector<16x128xf32>
    %38 = tpu.matmul %35, %37, %cst_42 {dimension_numbers = #tpu.dot_dimension_numbers<[1], [0], [0], [1], [0, 0, 1, 1], [], []>} : vector<16x128xf32>, vector<128x128xf32>, vector<16x128xf32> -> vector<16x128xf32>
    %39 = arith.addf %34, %38 : vector<16x128xf32>
    %c1_43 = arith.constant 1 : index
    %c0_44 = arith.constant 0 : index
    %40 = vector.load %arg13[%c1_43, %c0_44] : memref<18x128xf32, #tpu.memory_space<vmem>>, vector<16x128xf32>
    %c1_45 = arith.constant 1 : index
    %c0_46 = arith.constant 0 : index
    %c0_47 = arith.constant 0 : index
    %41 = vector.load %arg5[%c1_45, %c0_46, %c0_47] : memref<3x128x128xf32, #tpu.memory_space<vmem>>, vector<1x128x128xf32>
    %42 = vector.shape_cast %41 : vector<1x128x128xf32> to vector<128x128xf32>
    %cst_48 = arith.constant dense<0.000000e+00> : vector<16x128xf32>
    %43 = tpu.matmul %40, %42, %cst_48 {dimension_numbers = #tpu.dot_dimension_numbers<[1], [0], [0], [1], [0, 0, 1, 1], [], []>} : vector<16x128xf32>, vector<128x128xf32>, vector<16x128xf32> -> vector<16x128xf32>
    %44 = arith.addf %39, %43 : vector<16x128xf32>
    %c2_49 = arith.constant 2 : index
    %c0_50 = arith.constant 0 : index
    %45 = vector.load %arg13[%c2_49, %c0_50] : memref<18x128xf32, #tpu.memory_space<vmem>>, vector<16x128xf32>
    %c2_51 = arith.constant 2 : index
    %c0_52 = arith.constant 0 : index
    %c0_53 = arith.constant 0 : index
    %46 = vector.load %arg5[%c2_51, %c0_52, %c0_53] : memref<3x128x128xf32, #tpu.memory_space<vmem>>, vector<1x128x128xf32>
    %47 = vector.shape_cast %46 : vector<1x128x128xf32> to vector<128x128xf32>
    %cst_54 = arith.constant dense<0.000000e+00> : vector<16x128xf32>
    %48 = tpu.matmul %45, %47, %cst_54 {dimension_numbers = #tpu.dot_dimension_numbers<[1], [0], [0], [1], [0, 0, 1, 1], [], []>} : vector<16x128xf32>, vector<128x128xf32>, vector<16x128xf32> -> vector<16x128xf32>
    %49 = arith.addf %44, %48 : vector<16x128xf32>
    %c0_55 = arith.constant 0 : index
    %c0_56 = arith.constant 0 : index
    %50 = vector.load %arg6[%c0_55, %c0_56] : memref<1x128xf32, #tpu.memory_space<vmem>>, vector<1x128xf32>
    %51 = vector.broadcast %50 : vector<1x128xf32> to vector<16x128xf32>
    %52 = arith.mulf %49, %51 : vector<16x128xf32>
    %c0_57 = arith.constant 0 : index
    %c0_58 = arith.constant 0 : index
    %53 = vector.load %arg7[%c0_57, %c0_58] : memref<1x128xf32, #tpu.memory_space<vmem>>, vector<1x128xf32>
    %54 = vector.broadcast %53 : vector<1x128xf32> to vector<16x128xf32>
    %55 = arith.addf %52, %54 : vector<16x128xf32>
    %c0_59 = arith.constant 0 : index
    %c0_60 = arith.constant 0 : index
    %56 = vector.load %arg8[%c0_59, %c0_60] : memref<64x128xf32, #tpu.memory_space<vmem>>, vector<64x128xf32>
    %cst_61 = arith.constant dense<0.000000e+00> : vector<16x128xf32>
    %57 = tpu.matmul %1, %56, %cst_61 {dimension_numbers = #tpu.dot_dimension_numbers<[1], [0], [0], [1], [0, 0, 1, 1], [], []>} : vector<16x64xf32>, vector<64x128xf32>, vector<16x128xf32> -> vector<16x128xf32>
    %c0_62 = arith.constant 0 : index
    %c0_63 = arith.constant 0 : index
    %58 = vector.load %arg9[%c0_62, %c0_63] : memref<1x128xf32, #tpu.memory_space<vmem>>, vector<1x128xf32>
    %59 = vector.broadcast %58 : vector<1x128xf32> to vector<16x128xf32>
    %60 = arith.mulf %57, %59 : vector<16x128xf32>
    %c0_64 = arith.constant 0 : index
    %c0_65 = arith.constant 0 : index
    %61 = vector.load %arg10[%c0_64, %c0_65] : memref<1x128xf32, #tpu.memory_space<vmem>>, vector<1x128xf32>
    %62 = vector.broadcast %61 : vector<1x128xf32> to vector<16x128xf32>
    %63 = arith.addf %60, %62 : vector<16x128xf32>
    %64 = arith.addf %55, %63 : vector<16x128xf32>
    %cst_66 = arith.constant 0.000000e+00 : f32
    %65 = vector.broadcast %cst_66 : f32 to vector<16x128xf32>
    %66 = arith.maximumf %64, %65 : vector<16x128xf32>
    %c0_67 = arith.constant 0 : index
    %c0_68 = arith.constant 0 : index
    %c0_69 = arith.constant 0 : index
    %67 = vector.load %arg11[%c0_67, %c0_68, %c0_69] : memref<1x16x128xf32, #tpu.memory_space<vmem>>, vector<1x16x128xf32>
    %68 = vector.shape_cast %67 : vector<1x16x128xf32> to vector<16x128xf32>
    %69 = vector.shape_cast %66 : vector<16x128xf32> to vector<1x16x128xf32>
    tpu.vector_store %arg11[%c0_67, %c0_68, %c0_69], %69 {strides = array<i32>} : memref<1x16x128xf32, #tpu.memory_space<vmem>>, vector<1x16x128xf32>,
    return
  }
  func.func @transform_0(%arg0: i32) -> (i32, i32, i32) {
    %c0_i32 = arith.constant 0 : i32
    %c0_i32_0 = arith.constant 0 : i32
    %c0_i32_1 = arith.constant 0 : i32
    return %arg0, %c0_i32, %c0_i32_0 : i32, i32, i32
  }
  func.func @transform_1(%arg0: i32) -> (i32, i32, i32) {
    %c0_i32 = arith.constant 0 : i32
    %c0_i32_0 = arith.constant 0 : i32
    %c0_i32_1 = arith.constant 0 : i32
    %c0_i32_2 = arith.constant 0 : i32
    return %c0_i32, %c0_i32_0, %c0_i32_1 : i32, i32, i32
  }
  func.func @transform_2(%arg0: i32) -> (i32, i32) {
    %c0_i32 = arith.constant 0 : i32
    %c0_i32_0 = arith.constant 0 : i32
    %c0_i32_1 = arith.constant 0 : i32
    return %c0_i32, %c0_i32_0 : i32, i32
  }
  func.func @transform_3(%arg0: i32) -> (i32, i32) {
    %c0_i32 = arith.constant 0 : i32
    %c0_i32_0 = arith.constant 0 : i32
    %c0_i32_1 = arith.constant 0 : i32
    return %c0_i32, %c0_i32_0 : i32, i32
  }
  func.func @transform_4(%arg0: i32) -> (i32, i32, i32) {
    %c0_i32 = arith.constant 0 : i32
    %c0_i32_0 = arith.constant 0 : i32
    %c0_i32_1 = arith.constant 0 : i32
    %c0_i32_2 = arith.constant 0 : i32
    return %c0_i32, %c0_i32_0, %c0_i32_1 : i32, i32, i32
  }
  func.func @transform_5(%arg0: i32) -> (i32, i32) {
    %c0_i32 = arith.constant 0 : i32
    %c0_i32_0 = arith.constant 0 : i32
    %c0_i32_1 = arith.constant 0 : i32
    return %c0_i32, %c0_i32_0 : i32, i32
  }
  func.func @transform_6(%arg0: i32) -> (i32, i32) {
    %c0_i32 = arith.constant 0 : i32
    %c0_i32_0 = arith.constant 0 : i32
    %c0_i32_1 = arith.constant 0 : i32
    return %c0_i32, %c0_i32_0 : i32, i32
  }
  func.func @transform_7(%arg0: i32) -> (i32, i32) {
    %c0_i32 = arith.constant 0 : i32
    %c0_i32_0 = arith.constant 0 : i32
    %c0_i32_1 = arith.constant 0 : i32
    return %c0_i32, %c0_i32_0 : i32, i32
  }
  func.func @transform_8(%arg0: i32) -> (i32, i32) {
    %c0_i32 = arith.constant 0 : i32
    %c0_i32_0 = arith.constant 0 : i32
    %c0_i32_1 = arith.constant 0 : i32
    return %c0_i32, %c0_i32_0 : i32, i32
  }
  func.func @transform_9(%arg0: i32) -> (i32, i32) {
    %c0_i32 = arith.constant 0 : i32
    %c0_i32_0 = arith.constant 0 : i32
    %c0_i32_1 = arith.constant 0 : i32
    return %c0_i32, %c0_i32_0 : i32, i32
  }
  func.func @transform_10(%arg0: i32) -> (i32, i32, i32) {
    %c0_i32 = arith.constant 0 : i32
    %c0_i32_0 = arith.constant 0 : i32
    %c0_i32_1 = arith.constant 0 : i32
    return %arg0, %c0_i32, %c0_i32_0 : i32, i32, i32
  }
}

</mosaic_0001>

<bundles_post_ra>
// kernel: tpu_custom_call.1
= control target key start
LH: loop header
LB: loop body
LE: loop exit
PB: predicated region body
PF: predicated region fallthrough
CT: control target
= control target key end

     0   :  { %s2388_s0 = inlined_call_operand.hbm [shape: f32[2,16,64], index: 0, kind: input, shape index: {}]   ;;  %s2389_s1 = inlined_call_operand.hbm [shape: f32[3,64,128], index: 1, kind: input, shape index: {}]   ;;  %s2390_s2 = inlined_call_operand.vmem [shape: f32[1,128], index: 2, kind: input, shape index: {}]   ;;  %s2391_s3 = inlined_call_operand.vmem [shape: f32[1,128], index: 3, kind: input, shape index: {}]   ;;  %s2392_s4 = inlined_call_operand.hbm [shape: f32[3,128,128], index: 4, kind: input, shape index: {}]   ;;  %s2393_s5 = inlined_call_operand.vmem [shape: f32[1,128], index: 5, kind: input, shape index: {}]   ;;  %s2394_s6 = inlined_call_operand.vmem [shape: f32[1,128], index: 6, kind: input, shape index: {}]   ;;  %s2395_s7 = inlined_call_operand.hbm [shape: f32[64,128], index: 7, kind: input, shape index: {}]   ;;  %s2396_s8 = inlined_call_operand.vmem [shape: f32[1,128], index: 8, kind: input, shape index: {}]   ;;  %s2397_s9 = inlined_call_operand.vmem [shape: f32[1,128], index: 9, kind: input, shape index: {}]   ;;  %s2398_s10 = inlined_call_operand.hbm [shape: f32[2,16,128], index: 10, kind: output, shape index: {}]  }
   0x1   :  { %2405 = sst [smem:[#allocation19_spill]] %s2394_s6 }
   0x2   :  { %2406 = sst [smem:[#allocation20_spill]] %s2398_s10 }
   0x3   :  { %15 = vsyncpa [#allocation5], 0 }
   0x4   :  { %17 = vsyncpa [#allocation5 + $0x1], 0 }
   0x5   :  { %18 = vsyncpa [#allocation8], 0 }
   0x6   :  { %19 = vsyncpa [#allocation11], 0 }
   0x7   :  { %20 = vsyncpa [#allocation6], 0 }
   0x8   :  { %22 = vsyncpa [#allocation6 + $0x1], 0  ;;  %s2077_s13 = smov 0   ;;  %s2079_s14 = smov 0  }
   0x9   :  { %s2081_s15 = smov 0   ;;  %s2083_s16 = smov 0  }
   0xa LB: > { %2407 = sst [smem:[#allocation17_spill]] %s1998_s13  ;;  %s2098_s17 = sadd.s32 4294967295, %s2010_s16   ;;  %s2010_s16 = sphi %s2083_s16, %s2433_s16   ;;  %s2006_s15 = sphi %s2081_s15, %s2432_s15   ;;  %s2002_s14 = sphi %s2079_s14, %s2431_s14   ;;  %s1998_s13 = sphi %s2077_s13, %s2430_s13  }
   0xb   : > { %s1261_s18 = sadd.s32 4294967294, %s2010_s16   ;;  %p48_p0 = scmp.ne.s32.totalorder %s2002_s14, %s1998_s13 }
   0xc   : > { %p2399_p1 = scmp.eq.s32.totalorder %s2098_s17, 0  ;;  %p267_p3 = scmp.eq.s32.totalorder %s1261_s18, 1 }
   0xd   : > { %p1262_p5 = scmp.ge.s32.totalorder %s2010_s16, 1  ;;  %p274_p7 = scmp.lt.s32.totalorder %s2010_s16, 3 }
   0xe   : > { %p2107_p4 = por %p2399_p1, %p48_p0  ;;  %p2112_p6 = por %p267_p3, %p48_p0 }
   0xf   : > { %p2117_p8 = pnand %p1262_p5, %p274_p7  ;;  %s2012_s22 = smov [#allocation7]  }
  0x10   : > { %s2408_s19 = scalar_select %p2107_p4, 1, 0 }
  0x11   : > { %s2409_s20 = scalar_select %p2112_p6, 1, 0 }
  0x12   : > { %s2411_s21 = scalar_select %p2117_p8, 1, 0 }
  0x13   : > { %2410 = sst [smem:[#allocation18_spill]] %s2409_s20  ;;  %s286_s23 = sshll.u32 %s2012_s22, 4  ;;  %s2121_s23 = int_to_ptr.vmem [resolvable:$true] %s286_s23 }
  0x14   : > { %p1756_p9 = pneg %p2117_p8  ;;  %s2013_s25 = smov [#allocation9]  }
  0x15   : > { %s305_s26 = sshll.u32 %s2013_s25, 4  ;;  %s2014_s27 = smov [#allocation10]   ;;  %s2132_s26 = int_to_ptr.vmem [resolvable:$true] %s305_s26 }
  0x16   : > { %p2128_p11 = pnand %p1756_p9, %p2399_p1  ;;  %s2134_s28 = sshll.u32 %s2014_s27, 4  ;;  %s325_s28 = int_to_ptr.vmem [resolvable:$true] %s2134_s28 }
  0x17   : > { %s1822_s11 = scalar_lea.hbm %s2389_s1, 3072 }
  0x18   : > { %p1823_p12 = scmp.ne.s32.totalorder %s2389_s1, %s1822_s11  ;;  %p2144_p13 = pneg %p2128_p11 }
  0x19   : > { %p1829_p5 = scmp.lt.u32.totalorder %s1822_s11, %s2389_s1 }
  0x1a   : > { %p1825_p0 = pnand %p2144_p13, %p1823_p12 }
  0x1c   : > { %p1826_p3 = pneg %p1825_p0 }
  0x1e   : > { %p1831_p7 = pnand %p1829_p5, %p1826_p3 }
  0x20   : > { %1834 = shalt.err (!%p1831_p7)
}
  0x21   : > { %s1835_s29 = scalar_lea.vmem %s2121_s23, 3072  ;;  %p1843_p2 = scmp.lt.s32.totalorder %s2121_s23, %s2121_s23 }
  0x22   : > { %p1836_p9 = scmp.ne.s32.totalorder %s2121_s23, %s1835_s29  ;;  %p1844_p6 = scmp.lt.s32.totalorder %s1835_s29, %s1835_s29 }
  0x24   : > { %p1838_p10 = pnand %p1836_p9, %p2144_p13  ;;  %p1845_p12 = por %p1844_p6, %p1843_p2 }
  0x26   : > { %p1839_p1 = pneg %p1838_p10 }
  0x28   : > { %p1846_p0 = pnand %p1845_p12, %p1839_p1 }
  0x2a   : > { %1849 = shalt.err (!%p1846_p0)
}
  0x2b   : > { %s2015_s30 = smov 128   ;;  %s2016_s11 = smov 8  }
  0x2c   : > { %1759 = dma.hbm_to_vmem [thread:$0]  (!%p2128_p11), %s2389_s1, 3072, %s2121_s23, [#allocation8], %s2015_s30, %s2015_s30, %s2016_s11  }
  0x2d   : > { %s1850_s29 = scalar_lea.hbm %s2392_s4, 6144 }
  0x2e   : > { %p1851_p1 = scmp.ne.s32.totalorder %s2392_s4, %s1850_s29  ;;  %p1857_p10 = scmp.lt.u32.totalorder %s1850_s29, %s2392_s4 }
  0x30   : > { %p1853_p2 = pnand %p1851_p1, %p2144_p13 }
  0x32   : > { %p1854_p6 = pneg %p1853_p2 }
  0x34   : > { %p1859_p3 = pnand %p1857_p10, %p1854_p6 }
  0x36   : > { %1862 = shalt.err (!%p1859_p3)
}
  0x37   : > { %s1863_s23 = scalar_lea.vmem %s2132_s26, 6144  ;;  %p1871_p12 = scmp.lt.s32.totalorder %s2132_s26, %s2132_s26 }
  0x38   : > { %p1864_p5 = scmp.ne.s32.totalorder %s2132_s26, %s1863_s23  ;;  %p1872_p0 = scmp.lt.s32.totalorder %s1863_s23, %s1863_s23 }
  0x3a   : > { %p1866_p7 = pnand %p1864_p5, %p2144_p13  ;;  %p1873_p1 = por %p1872_p0, %p1871_p12 }
  0x3c   : > { %p1867_p9 = pneg %p1866_p7 }
  0x3e   : > { %p1874_p2 = pnand %p1873_p1, %p1867_p9 }
  0x40   : > { %1877 = shalt.err (!%p1874_p2)
}
  0x41   : > { %1762 = dma.hbm_to_vmem [thread:$0]  (!%p2128_p11), %s2392_s4, 6144, %s2132_s26, [#allocation8], %s2015_s30, %s2015_s30, %s2016_s11  }
  0x42   : > { %s1878_s12 = scalar_lea.hbm %s2395_s7, 1024 }
  0x43   : > { %p1879_p6 = scmp.ne.s32.totalorder %s2395_s7, %s1878_s12  ;;  %p1885_p5 = scmp.lt.u32.totalorder %s1878_s12, %s2395_s7 }
  0x45   : > { %p1881_p10 = pnand %p1879_p6, %p2144_p13 }
  0x47   : > { %p1882_p3 = pneg %p1881_p10 }
  0x49   : > { %p1887_p7 = pnand %p1885_p5, %p1882_p3 }
  0x4b   : > { %1890 = shalt.err (!%p1887_p7)
}
  0x4c   : > { %s1891_s23 = scalar_lea.vmem %s325_s28, 1024  ;;  %p1899_p1 = scmp.lt.s32.totalorder %s325_s28, %s325_s28 }
  0x4d   : > { %p1892_p9 = scmp.ne.s32.totalorder %s325_s28, %s1891_s23  ;;  %p1900_p2 = scmp.lt.s32.totalorder %s1891_s23, %s1891_s23 }
  0x4f   : > { %p1894_p12 = pnand %p1892_p9, %p2144_p13  ;;  %p1901_p4 = por %p1900_p2, %p1899_p1 }
  0x51   : > { %p1895_p0 = pneg %p1894_p12 }
  0x53   : > { %p1902_p8 = pnand %p1901_p4, %p1895_p0 }
  0x55   : > { %1905 = shalt.err (!%p1902_p8)
}
  0x56   : > { %1765 = dma.hbm_to_vmem [thread:$0]  (!%p2128_p11), %s2395_s7, 1024, %s325_s28, [#allocation11], %s2015_s30, %s2015_s30, %s2016_s11  }
  0x57   : > { %s2217_s22 = sadd.s32 1, %s2010_s16   ;;  %s35_s10 = sadd.s32 1, %s2006_s15 }
  0x58   : > { %s32_s24 = ssub.s32 %s2010_s16, %s2217_s22  ;;  %p42_p8 = scmp.ne.s32.totalorder %s2006_s15, %s2002_s14 }
  0x59   : > { %p33_p4 = scmp.eq.s32.totalorder %s32_s24, 0  ;;  %p43_p13 = scmp.eq.s32.totalorder %s2010_s16, 0 }
  0x5a   : > { %p1777_p6 = scmp.lt.s32.totalorder %s2010_s16, 2  ;;  %p2414_p3 = scmp.eq.s32.totalorder %s2098_s17, 1 }
  0x5b   : > { %s2227_s13 = scalar_select %p33_p4, %s2006_s15, %s35_s10  }
  0x5c   : > { %p44_p10 = por %p43_p13, %p42_p8  ;;  %p2231_p5 = por %p2414_p3, %p42_p8 }
  0x5d   : > { %s344_s12 = sand.u32 1, %s2006_s15   ;;  %s1295_s18 = sshll.u32 %s2010_s16, 8 }
  0x5e   : > { %s1267_s28 = sshll.u32 %s344_s12, 4  ;;  %s2240_s29 = scalar_lea.hbm %s2388_s0, %s1295_s18 }
  0x5f   : > { %s348_s23 = scalar_lea.vmem [#allocation4], %s1267_s28  ;;  %p2242_p11 = pnand %p1777_p6, %p44_p10 }
  0x60   : > { %s355_s26 = sshll.u32 %s348_s23, 4  ;;  %s2248_s24 = scalar_lea.sflag [#allocation5], %s344_s12  ;;  %s2246_s26 = int_to_ptr.vmem [resolvable:$true] %s355_s26 }
  0x61   : > { %s1906_s10 = scalar_lea.hbm %s2240_s29, 256  ;;  %p1908_p9 = pneg %p2242_p11 }
  0x62   : > { %p1907_p7 = scmp.ne.s32.totalorder %s2240_s29, %s1906_s10  ;;  %s1911_s25 = scalar_lea.hbm %s2388_s0, 512 }
  0x63   : > { %p1912_p1 = scmp.lt.u32.totalorder %s2240_s29, %s2388_s0  ;;  %p1913_p2 = scmp.lt.u32.totalorder %s1911_s25, %s1906_s10 }
  0x64   : > { %p1909_p12 = pnand %p1908_p9, %p1907_p7  ;;  %p1915_p8 = scmp.lt.u32.totalorder %s1906_s10, %s2240_s29 }
  0x65   : > { %p1914_p4 = por %p1913_p2, %p1912_p1 }
  0x66   : > { %p1910_p0 = pneg %p1909_p12 }
  0x67   : > { %p1916_p13 = por %p1915_p8, %p1914_p4 }
  0x69   : > { %p1917_p6 = pnand %p1916_p13, %p1910_p0 }
  0x6b   : > { %1920 = shalt.err (!%p1917_p6)
}
  0x6c   : > { %s1921_s12 = scalar_lea.vmem %s2246_s26, 256  ;;  %s2017_s18 = smov [#allocation4]  }
  0x6d   : > { %p1922_p10 = scmp.ne.s32.totalorder %s2246_s26, %s1921_s12  ;;  %s1926_s28 = sshll.u32 %s2017_s18, 4  ;;  %s1927_s28 = int_to_ptr.vmem [resolvable:$false] %s1926_s28 }
  0x6e   : > { %s1928_s27 = scalar_lea.vmem %s1927_s28, 512  ;;  %p1929_p12 = scmp.lt.s32.totalorder %s2246_s26, %s1927_s28 }
  0x6f   : > { %p1924_p3 = pnand %p1922_p10, %p1908_p9  ;;  %p1930_p1 = scmp.lt.s32.totalorder %s1928_s27, %s1921_s12 }
  0x71   : > { %p1925_p7 = pneg %p1924_p3  ;;  %p1931_p2 = por %p1930_p1, %p1929_p12 }
  0x73   : > { %p1932_p4 = pnand %p1931_p2, %p1925_p7 }
  0x75   : > { %1935 = shalt.err (!%p1932_p4)
}
  0x76   : > { %1769 = dma.hbm_to_vmem [thread:$0]  (!%p2242_p11), %s2240_s29, 256, %s2246_s26, %s2248_s24, %s2015_s30, %s2015_s30, %s2016_s11  }
  0x77   : > { %p2417_p9 = scmp.ne.s32.totalorder %s2411_s21, 0 }
  0x78   : > { %s2282_s10 = sand.u32 (!%p2417_p9), 1, %s2002_s14   ;;  %p2418_p0 = scmp.ne.s32.totalorder (!%p2417_p9), %s2408_s19, 0 }
  0x79   : > { %367 = sbr.rel (%p2417_p9) target bundleno = 707 (0x2c3), region = 60  ;;  %s1271_s25 = sshll.u32 (!%p2417_p9), %s2282_s10, 4 }
  0x7a   : > { %s370_s23 = scalar_lea.sflag (!%p2417_p9), [#allocation5], %s2282_s10  ;;  %s373_s6 = scalar_lea.vmem (!%p2417_p9), [#allocation4], %s1271_s25 }
  0x80   : > { %1981 = dma.done.wait (%p2418_p0), %s370_s23, 256  }
  0x81   : > { %1983 = vsyncadd (%p2418_p0), %s370_s23, 4294967040  ;;  %p2419_p11 = scmp.eq.s32.totalorder %s2098_s17, 0 }
  0x83   : > { %1985 = dma.done.wait (%p2419_p11), [#allocation8], 9216   ;;  %p2420_p8 = pmov %p2419_p11 }
  0x85   : > { %1987 = vsyncadd (%p2420_p8), [#allocation8], 4294958080  ;;  %p2421_p13 = pmov %p2420_p8 }
  0x86   : > { %p2422_p6 = pmov %p2420_p8 }
  0x87   : > { %1989 = dma.done.wait (%p2421_p13), [#allocation11], 1024  }
  0x88   : > { %1991 = vsyncadd (%p2422_p6), [#allocation11], 4294966272  ;;  %vm424_vm0 = vcmask 516096   ;;  %v2018_v0 = vmov 0.0   ;;  %v443_v1 = vld [vmem:[#allocation7 + $0x40] sm:$0xff]  ;;  %v444_v2 = vld [vmem:[#allocation7 + $0x48] sm:$0xff] }
  0x89   : > { %425 = vst.msk [vmem:[#allocation2] sm:$0x1] %vm424_vm0, %v2018_v0  ;;  %426 = vst.msk [vmem:[#allocation2 + $0x11] sm:$0x1] %vm424_vm0, %v2018_v0  ;;  %v445_v3 = vld [vmem:[#allocation7 + $0x50] sm:$0xff]  ;;  %vm427_vm1 = vcmask 523264   ;;  %v1572_v4 = vpack.c.bf16 %v444_v2, %v443_v1 }
  0x8a   : > { %727 = vst [vmem:[#allocation3] sm:$0x1] %v2018_v0  ;;  %728 = vst [vmem:[#allocation3 + $0x11] sm:$0x1] %v2018_v0  ;;  %v446_v5 = vld [vmem:[#allocation7 + $0x58] sm:$0xff]  ;;  %v447_v7 = vld [vmem:[#allocation7 + $0x60] sm:$0xff] }
  0x8b   : > { %v1576_v6 = vpack.c.bf16 %v446_v5, %v445_v3  ;;  %v448_v8 = vld [vmem:[#allocation7 + $0x68] sm:$0xff]  ;;  %v2300_v9 = vld [vmem:[%s373_s6] sm:$0xff]  ;;  %1573 = vmatprep.subr.bf16.mxu0 %v1572_v4  ;;  %v450_v13 = vld [vmem:[#allocation7 + $0x78] sm:$0xff]  ;;  %s421_s19 = scalar_lea.vmem [#allocation12], %s1271_s25  ;;  %s1296_s30 = sshll.u32 %s2098_s17, 8 }
  0x8c   : > { %428 = vst.msk [vmem:[#allocation2 + $0x1] sm:$0xff] %vm427_vm1, %v2300_v9  ;;  %v2304_v10 = vld [vmem:[%s373_s6 + $0x8] sm:$0xff]  ;;  %1575 = vmatpush3.bf16.msra.mxu0 %v1572_v4  ;;  %v1580_v11 = vpack.c.bf16 %v448_v8, %v447_v7  ;;  %v449_v12 = vld [vmem:[#allocation7 + $0x70] sm:$0xff]  ;;  %v752_v14 = vld [vmem:[#allocation9 + $0x80] sm:$0xff]  ;;  %s2423_s6 = sld [smem:[#allocation19_spill]]  ;;  %s1159_s21 = sshll.u32 %s421_s19, 4  ;;  %s2339_s21 = int_to_ptr.vmem [resolvable:$true] %s1159_s21 }
  0x8d   : > { %429 = vst.msk [vmem:[#allocation2 + $0x9] sm:$0xff] %vm427_vm1, %v2304_v10  ;;  %1577 = vmatprep.subr.bf16.mxu0 %v1576_v6  ;;  %v1584_v15 = vpack.c.bf16 %v450_v13, %v449_v12  ;;  %v753_v16 = vld [vmem:[#allocation9 + $0x88] sm:$0xff]  ;;  %v754_v17 = vld [vmem:[#allocation9 + $0x90] sm:$0xff]  ;;  %v755_v18 = vld [vmem:[#allocation9 + $0x98] sm:$0xff]  ;;  %s2424_s26 = sld [smem:[#allocation20_spill]]  ;;  %s1146_s25 = scalar_lea.sflag [#allocation6], %s2282_s10 }
  0x8e   : > { %v432_v20 = vld [vmem:[#allocation7] sm:$0xff]  ;;  %v433_v21 = vld [vmem:[#allocation7 + $0x8] sm:$0xff]  ;;  %v1620_v22 = vpack.c.bf16 %v753_v16, %v752_v14  ;;  %v1624_v23 = vpack.c.bf16 %v755_v18, %v754_v17  ;;  %v434_v27 = vld [vmem:[#allocation7 + $0x10] sm:$0xff]  ;;  %s1936_s12 = scalar_lea.vmem %s2339_s21, 256  ;;  %s2019_s17 = smov [#allocation12]  }
  0x8f   : > { %v756_v24 = vld [vmem:[#allocation9 + $0xa0] sm:$0xff]  ;;  %v757_v25 = vld [vmem:[#allocation9 + $0xa8] sm:$0xff]  ;;  %v1588_v26 = vpack.c.bf16 %v433_v21, %v432_v20  ;;  %v435_v28 = vld [vmem:[#allocation7 + $0x18] sm:$0xff]  ;;  %p1937_p10 = scmp.ne.s32.totalorder %s2339_s21, %s1936_s12  ;;  %s1940_s18 = sshll.u32 %s2019_s17, 4  ;;  %s1941_s18 = int_to_ptr.vmem [resolvable:$false] %s1940_s18 }
  0x90   : > { %1579 = vmatpush3.bf16.msra.mxu0 %v1576_v6  ;;  %1621 = vmatprep.subr.bf16.mxu1 %v1620_v22  ;;  %v1628_v29 = vpack.c.bf16 %v757_v25, %v756_v24  ;;  %v758_v30 = vld [vmem:[#allocation9 + $0xb0] sm:$0xff]  ;;  %v759_v31 = vld [vmem:[#allocation9 + $0xb8] sm:$0xff]  ;;  %v1592_v33 = vpack.c.bf16 %v435_v28, %v434_v27  ;;  %v436_v35 = vld [vmem:[#allocation7 + $0x20] sm:$0xff]  ;;  %s1942_s28 = scalar_lea.vmem %s1941_s18, 512  ;;  %p1943_p12 = scmp.lt.s32.totalorder %s2339_s21, %s1941_s18 }
  0x91   : > { %1581 = vmatprep.subr.bf16.mxu0 %v1580_v11  ;;  %1623 = vmatpush3.bf16.msra.mxu1 %v1620_v22  ;;  %v437_v36 = vld [vmem:[#allocation7 + $0x28] sm:$0xff]  ;;  %v1632_v37 = vpack.c.bf16 %v759_v31, %v758_v30  ;;  %v438_v39 = vld [vmem:[#allocation7 + $0x30] sm:$0xff]  ;;  %v439_v40 = vld [vmem:[#allocation7 + $0x38] sm:$0xff]  ;;  %p1938_p3 = pnand %p1937_p10, %p2231_p5  ;;  %p1944_p1 = scmp.lt.s32.totalorder %s1942_s28, %s1936_s12 }
  0x92   : > { %1625 = vmatprep.subr.bf16.mxu1 %v1624_v23  ;;  %v1596_v38 = vpack.c.bf16 %v437_v36, %v436_v35  ;;  %v1600_v41 = vpack.c.bf16 %v439_v40, %v438_v39  ;;  %v616_v42 = vld [vmem:[#allocation7 + $0x80] sm:$0xff]  ;;  %v617_v43 = vld [vmem:[#allocation7 + $0x88] sm:$0xff]  ;;  %v618_v45 = vld [vmem:[#allocation7 + $0x90] sm:$0xff] }
  0x93   : > { %v440_v19 = vld [vmem:[#allocation2 + $0x1] sm:$0xff]  ;;  %v1604_v44 = vpack.c.bf16 %v617_v43, %v616_v42  ;;  %v620_v50 = vld [vmem:[#allocation7 + $0xa0] sm:$0xff]  ;;  %v621_v51 = vld [vmem:[#allocation7 + $0xa8] sm:$0xff]  ;;  %s2344_s24 = scalar_lea.hbm %s2424_s26, %s1296_s30  ;;  %p1939_p7 = pneg %p1938_p3 }
  0x94   : > { %1407 = vmatprep.mubr.msk.f32.mxu0 %vm427_vm1, %v440_v19  ;;  %1583 = vmatpush3.bf16.msra.mxu0 %v1580_v11  ;;  %v441_v32 = vld [vmem:[#allocation2 + $0x9] sm:$0xff]  ;;  %v430_v34 = vld [vmem:[#allocation2] sm:$0xff]  ;;  %v1612_v52 = vpack.c.bf16 %v621_v51, %v620_v50  ;;  %v761_v58 = vld [vmem:[#allocation9 + $0xc8] sm:$0xff]  ;;  %p1945_p2 = por %p1944_p1, %p1943_p12 }
  0x95   : > { %1585 = vmatprep.subr.bf16.mxu0 %v1584_v15  ;;  %1627 = vmatpush3.bf16.msra.mxu1 %v1624_v23  ;;  %v619_v46 = vld [vmem:[#allocation7 + $0x98] sm:$0xff]  ;;  %v622_v53 = vld [vmem:[#allocation7 + $0xb0] sm:$0xff]  ;;  %v760_v57 = vld [vmem:[#allocation9 + $0xc0] sm:$0xff] }
  0x96   : > { %1629 = vmatprep.subr.bf16.mxu1 %v1628_v29  ;;  %v431_v47 = vld [vmem:[#allocation2 + $0x8] sm:$0xff]  ;;  %v1608_v48 = vpack.c.bf16 %v619_v46, %v618_v45  ;;  %v1636_v59 = vpack.c.bf16 %v761_v58, %v760_v57  ;;  %v762_v60 = vld [vmem:[#allocation9 + $0xd0] sm:$0xff]  ;;  %v764_v63 = vld [vmem:[#allocation9 + $0xe0] sm:$0xff]  ;;  %p1946_p4 = pnand %p1945_p2, %p1939_p7 }
  0x97   : > { %v613_v49 = vld [vmem:[#allocation2 + $0x2] sm:$0xff]  ;;  %v614_v56 = vld [vmem:[#allocation2 + $0xa] sm:$0xff]  ;;  %v765_v0 = vld [vmem:[#allocation9 + $0xe8] sm:$0xff] }
  0x98   : > { %1587 = vmatpush3.bf16.msra.mxu0 %v1584_v15  ;;  %v623_v54 = vld [vmem:[#allocation7 + $0xb8] sm:$0xff]  ;;  %v1644_v1 = vpack.c.bf16 %v765_v0, %v764_v63  ;;  %v766_v2 = vld [vmem:[#allocation9 + $0xf0] sm:$0xff]  ;;  %v733_v5 = vld [vmem:[#allocation9] sm:$0xff] }
  0x99   : > { %1589 = vmatprep.subr.bf16.mxu0 %v1588_v26  ;;  %1631 = vmatpush3.bf16.msra.mxu1 %v1628_v29  ;;  %v1616_v55 = vpack.c.bf16 %v623_v54, %v622_v53  ;;  %v763_v61 = vld [vmem:[#allocation9 + $0xd8] sm:$0xff]  ;;  %v734_v6 = vld [vmem:[#allocation9 + $0x8] sm:$0xff]  ;;  %v1032_v8 = vld [vmem:[#allocation10] sm:$0xff] }
  0x9a   : > { %1633 = vmatprep.subr.bf16.mxu1 %v1632_v37  ;;  %v1640_v62 = vpack.c.bf16 %v763_v61, %v762_v60  ;;  %v767_v3 = vld [vmem:[#allocation9 + $0xf8] sm:$0xff]  ;;  %v1652_v7 = vpack.c.bf16 %v734_v6, %v733_v5  ;;  %v1034_v12 = vld [vmem:[#allocation10 + $0x10] sm:$0xff]  ;;  %v1036_v15 = vld [vmem:[#allocation10 + $0x20] sm:$0xff] }
  0x9b   : > { %1408 = vmatmul.mubr.msk.f32.vlgmr.msra.gmra.mrb[0].mxu0 %vm427_vm1, %v441_v32  ;;  %v1648_v4 = vpack.c.bf16 %v767_v3, %v766_v2  ;;  %v1035_v13 = vld [vmem:[#allocation10 + $0x18] sm:$0xff]  ;;  %v1037_v16 = vld [vmem:[#allocation10 + $0x28] sm:$0xff]  ;;  %v1038_v18 = vld [vmem:[#allocation10 + $0x30] sm:$0xff] }
  0x9c   : > { %1591 = vmatpush3.bf16.msra.mxu0 %v1588_v26  ;;  %1426 = vmatprep.mubr.msk.f32.mxu0 %vm427_vm1, %v430_v34  ;;  %v1720_v14 = vpack.c.bf16 %v1035_v13, %v1034_v12  ;;  %v1724_v17 = vpack.c.bf16 %v1037_v16, %v1036_v15  ;;  %v1039_v19 = vld [vmem:[#allocation10 + $0x38] sm:$0xff]  ;;  %v1282_v21 = vld [vmem:[%s2390_s2] ss:$0 sm:$0xff]  ;;  %v738_v34 = vld [vmem:[#allocation9 + $0x28] sm:$0xff] }
  0x9d   : > { %1593 = vmatprep.subr.bf16.mxu0 %v1592_v33  ;;  %1635 = vmatpush3.bf16.msra.mxu1 %v1632_v37  ;;  %v1728_v20 = vpack.c.bf16 %v1039_v19, %v1038_v18  ;;  %v1283_v23 = vld [vmem:[%s2391_s3] ss:$0 sm:$0xff]  ;;  %v736_v30 = vld [vmem:[#allocation9 + $0x18] sm:$0xff]  ;;  %v741_v40 = vld [vmem:[#allocation9 + $0x40] sm:$0xff] }
  0x9e   : > { %1637 = vmatprep.subr.bf16.mxu1 %v1636_v59  ;;  %v735_v29 = vld [vmem:[#allocation9 + $0x10] sm:$0xff]  ;;  %v740_v37 = vld [vmem:[#allocation9 + $0x38] sm:$0xff]  ;;  %v745_v46 = vld [vmem:[#allocation9 + $0x60] sm:$0xff] }
  0x9f   : > { %v739_v36 = vld [vmem:[#allocation9 + $0x30] sm:$0xff]  ;;  %v748_v50 = vld [vmem:[#allocation9 + $0x78] sm:$0xff]  ;;  %v922_v53 = vld [vmem:[#allocation9 + $0x108] sm:$0xff] }
  0xa0   : > { %1595 = vmatpush3.bf16.msra.mxu0 %v1592_v33  ;;  %v737_v33 = vld [vmem:[#allocation9 + $0x20] sm:$0xff]  ;;  %v1664_v39 = vpack.c.bf16 %v740_v37, %v739_v36  ;;  %v743_v43 = vld [vmem:[#allocation9 + $0x50] sm:$0xff]  ;;  %v926_v60 = vld [vmem:[#allocation9 + $0x128] sm:$0xff] }
  0xa1   : > { %1597 = vmatprep.subr.bf16.mxu0 %v1596_v38  ;;  %1639 = vmatpush3.bf16.msra.mxu1 %v1636_v59  ;;  %v1660_v35 = vpack.c.bf16 %v738_v34, %v737_v33  ;;  %v925_v59 = vld [vmem:[#allocation9 + $0x120] sm:$0xff]  ;;  %v927_v63 = vld [vmem:[#allocation9 + $0x130] sm:$0xff]  ;;  %v928_v0 = vld [vmem:[#allocation9 + $0x138] sm:$0xff] }
  0xa2   : > { %1641 = vmatprep.subr.bf16.mxu1 %v1640_v62  ;;  %v929_v2 = vld [vmem:[#allocation9 + $0x140] sm:$0xff]  ;;  %v930_v3 = vld [vmem:[#allocation9 + $0x148] sm:$0xff]  ;;  %v931_v5 = vld [vmem:[#allocation9 + $0x150] sm:$0xff] }
  0xa3   : > { %v932_v6 = vld [vmem:[#allocation9 + $0x158] sm:$0xff]  ;;  %v935_v12 = vld [vmem:[#allocation9 + $0x170] sm:$0xff] }
  0xa4   : > { %1599 = vmatpush3.bf16.msra.mxu0 %v1596_v38  ;;  %v936_v13 = vld [vmem:[#allocation9 + $0x178] sm:$0xff]  ;;  %v1288_v18 = vld [vmem:[%s2396_s8] ss:$0 sm:$0xff] }
  0xa5   : > { %1601 = vmatprep.subr.bf16.mxu0 %v1600_v41  ;;  %1643 = vmatpush3.bf16.msra.mxu1 %v1640_v62  ;;  %v1692_v62 = vpack.c.bf16 %v926_v60, %v925_v59 }
  0xa6   : > { %1645 = vmatprep.subr.bf16.mxu1 %v1644_v1 }
  0xa8   : > { %1603 = vmatpush3.bf16.msra.mxu0 %v1600_v41  ;;  %v742_v41 = vld [vmem:[#allocation9 + $0x48] sm:$0xff] }
  0xa9   : > { %1605 = vmatprep.subr.bf16.mxu0 %v1604_v44  ;;  %1647 = vmatpush3.bf16.msra.mxu1 %v1644_v1  ;;  %v1668_v42 = vpack.c.bf16 %v742_v41, %v741_v40  ;;  %v1696_v1 = vpack.c.bf16 %v928_v0, %v927_v63 }
  0xaa   : > { %1649 = vmatprep.subr.bf16.mxu1 %v1648_v4 }
  0xab   : > { %1427 = vmatmul.mubr.msk.f32.vlgmr.msra.gmra.mrb[0].mxu0 %vm427_vm1, %v431_v47  ;;  %v746_v47 = vld [vmem:[#allocation9 + $0x68] sm:$0xff] }
  0xac   : > { %1607 = vmatpush3.bf16.msra.mxu0 %v1604_v44  ;;  %1445 = vmatprep.mubr.msk.f32.mxu0 %vm427_vm1, %v613_v49  ;;  %v744_v44 = vld [vmem:[#allocation9 + $0x58] sm:$0xff]  ;;  %v747_v49 = vld [vmem:[#allocation9 + $0x70] sm:$0xff] }
  0xad   : > { %1609 = vmatprep.subr.bf16.mxu0 %v1608_v48  ;;  %1651 = vmatpush3.bf16.msra.mxu1 %v1648_v4  ;;  %v1672_v45 = vpack.c.bf16 %v744_v44, %v743_v43  ;;  %v1680_v51 = vpack.c.bf16 %v748_v50, %v747_v49  ;;  %v1700_v4 = vpack.c.bf16 %v930_v3, %v929_v2 }
  0xae   : > { %1653 = vmatprep.subr.bf16.mxu1 %v1652_v7 }
  0xb0   : > { %1611 = vmatpush3.bf16.msra.mxu0 %v1608_v48  ;;  %v1676_v48 = vpack.c.bf16 %v746_v47, %v745_v46 }
  0xb1   : > { %1613 = vmatprep.subr.bf16.mxu0 %v1612_v52 }
  0xb4   : > { %1615 = vmatpush3.bf16.msra.mxu0 %v1612_v52  ;;  %v921_v52 = vld [vmem:[#allocation9 + $0x100] sm:$0xff] }
  0xb5   : > { %1617 = vmatprep.subr.bf16.mxu0 %v1616_v55  ;;  %v1684_v54 = vpack.c.bf16 %v922_v53, %v921_v52 }
  0xb8   : > { %1619 = vmatpush3.bf16.msra.mxu0 %v1616_v55  ;;  %v923_v55 = vld [vmem:[#allocation9 + $0x110] sm:$0xff] }
  0xbb   : > { %1446 = vmatmul.mubr.msk.f32.vlgmr.msra.gmra.mrb[0].mxu0 %vm427_vm1, %v614_v56  ;;  %v924_v56 = vld [vmem:[#allocation9 + $0x118] sm:$0xff] }
  0xbc   : > { %1569 = vmatprep.mubr.msk.f32.mxu0 %vm427_vm1, %v2300_v9  ;;  %v1033_v9 = vld [vmem:[#allocation10 + $0x8] sm:$0xff]  ;;  %v1688_v57 = vpack.c.bf16 %v924_v56, %v923_v55 }
  0xbd   : > { %v1716_v11 = vpack.c.bf16 %v1033_v9, %v1032_v8  ;;  %v933_v8 = vld [vmem:[#allocation9 + $0x160] sm:$0xff]  ;;  %v934_v9 = vld [vmem:[#allocation9 + $0x168] sm:$0xff] }
  0xbf   : > { %1717 = vmatprep.subr.bf16.mxu0 %v1716_v11 }
  0xc0   : > { %1719 = vmatpush3.bf16.msra.mxu0 %v1716_v11  ;;  %v1708_v11 = vpack.c.bf16 %v934_v9, %v933_v8 }
  0xc1   : > { %1721 = vmatprep.subr.bf16.mxu0 %v1720_v14 }
  0xc4   : > { %1723 = vmatpush3.bf16.msra.mxu0 %v1720_v14  ;;  %v1712_v14 = vpack.c.bf16 %v936_v13, %v935_v12 }
  0xc5   : > { %1725 = vmatprep.subr.bf16.mxu0 %v1724_v17 }
  0xc8   : > { %1727 = vmatpush3.bf16.msra.mxu0 %v1724_v17 }
  0xc9   : > { %1729 = vmatprep.subr.bf16.mxu0 %v1728_v20 }
  0xcc   : > { %1731 = vmatpush3.bf16.msra.mxu0 %v1728_v20  ;;  %v1289_v20 = vld [vmem:[%s2397_s9] ss:$0 sm:$0xff] }
  0xcf   : > { %1570 = vmatmul.mubr.msk.f32.vlgmr.msra.gmra.mrb[2].mxu0 %vm427_vm1, %v2304_v10  ;;  %v1656_v10 = vpack.c.bf16 %v736_v30, %v735_v29 }
 0x18e   : > { %v1447_v22 = vpop.f32.mrb[0].mxu0 }
 0x18f   : > { %v715_v24 = vmul.f32 %v1447_v22, %v1282_v21  ;;  %v696_v25 = vpop.f32.mrb[1].mxu0 }
 0x190   : > { %v714_v26 = vmul.f32 %v1282_v21, %v696_v25  ;;  %v1284_v21 = vld [vmem:[%s2393_s5] ss:$0 sm:$0xff] }
 0x191   : > { %v724_v27 = vadd.f32 %v1283_v23, %v715_v24  ;;  %v1285_v24 = vld [vmem:[%s2423_s6] ss:$0 sm:$0xff] }
 0x192   : > { %v723_v28 = vadd.f32 %v1283_v23, %v714_v26 }
 0x193   : > { %v726_v31 = vmax.f32 %v724_v27, 0.0 }
 0x194   : > { %v725_v32 = vmax.f32 %v723_v28, 0.0 }
 0x195   : > { %730 = vst [vmem:[#allocation3 + $0x9] sm:$0xff] %v726_v31 }
 0x196   : > { %729 = vst [vmem:[#allocation3 + $0x1] sm:$0xff] %v725_v32  ;;  %1480 = vmatprep.mubr.f32.mxu1 %v725_v32 }
 0x197   : > { %1481 = vmatmul.mubr.f32.vlgmr.msra.gmra.mrb[0].mxu1 %v726_v31 }
 0x198   : > { %1655 = vmatpush3.bf16.msra.mxu1 %v1652_v7  ;;  %v1704_v7 = vpack.c.bf16 %v932_v6, %v931_v5 }
 0x199   : > { %1657 = vmatprep.subr.bf16.mxu1 %v1656_v10 }
 0x19c   : > { %1659 = vmatpush3.bf16.msra.mxu1 %v1656_v10  ;;  %v919_v15 = vld [vmem:[#allocation3 + $0xa] sm:$0xff] }
 0x19d   : > { %v731_v38 = vld [vmem:[#allocation3] sm:$0xff]  ;;  %1661 = vmatprep.subr.bf16.mxu1 %v1660_v35  ;;  %v732_v58 = vld [vmem:[#allocation3 + $0x8] sm:$0xff] }
 0x19e   : > { %1515 = vmatprep.mubr.f32.mxu1 %v731_v38  ;;  %v918_v61 = vld [vmem:[#allocation3 + $0x2] sm:$0xff] }
 0x1a0   : > { %1663 = vmatpush3.bf16.msra.mxu1 %v1660_v35 }
 0x1a1   : > { %1665 = vmatprep.subr.bf16.mxu1 %v1664_v39 }
 0x1a2   : > { %v1571_v16 = vpop.f32.mrb[2].mxu0 }
 0x1a3   : > { %v1112_v17 = vpop.f32.mrb[3].mxu0  ;;  %v1129_v19 = vmul.f32 %v1571_v16, %v1288_v18 }
 0x1a4   : > { %1667 = vmatpush3.bf16.msra.mxu1 %v1664_v39  ;;  %v1128_v22 = vmul.f32 %v1288_v18, %v1112_v17 }
 0x1a5   : > { %1669 = vmatprep.subr.bf16.mxu1 %v1668_v42  ;;  %v1138_v25 = vadd.f32 %v1289_v20, %v1129_v19 }
 0x1a6   : > { %v1137_v28 = vadd.f32 %v1289_v20, %v1128_v22 }
 0x1a8   : > { %1671 = vmatpush3.bf16.msra.mxu1 %v1668_v42 }
 0x1a9   : > { %1673 = vmatprep.subr.bf16.mxu1 %v1672_v45 }
 0x1ac   : > { %1675 = vmatpush3.bf16.msra.mxu1 %v1672_v45 }
 0x1ad   : > { %1677 = vmatprep.subr.bf16.mxu1 %v1676_v48 }
 0x1b0   : > { %1679 = vmatpush3.bf16.msra.mxu1 %v1676_v48 }
 0x1b1   : > { %1681 = vmatprep.subr.bf16.mxu1 %v1680_v51 }
 0x1b4   : > { %1683 = vmatpush3.bf16.msra.mxu1 %v1680_v51 }
 0x1b5   : > { %1685 = vmatprep.subr.bf16.mxu1 %v1684_v54 }
 0x1b7   : > { %1516 = vmatmul.mubr.f32.vlgmr.msra.gmra.mrb[0].mxu1 %v732_v58 }
 0x1b8   : > { %1687 = vmatpush3.bf16.msra.mxu1 %v1684_v54  ;;  %1550 = vmatprep.mubr.f32.mxu1 %v918_v61 }
 0x1b9   : > { %1689 = vmatprep.subr.bf16.mxu1 %v1688_v57 }
 0x1bc   : > { %1691 = vmatpush3.bf16.msra.mxu1 %v1688_v57 }
 0x1bd   : > { %1693 = vmatprep.subr.bf16.mxu1 %v1692_v62 }
 0x1c0   : > { %1695 = vmatpush3.bf16.msra.mxu1 %v1692_v62 }
 0x1c1   : > { %1697 = vmatprep.subr.bf16.mxu1 %v1696_v1 }
 0x1c4   : > { %1699 = vmatpush3.bf16.msra.mxu1 %v1696_v1 }
 0x1c5   : > { %1701 = vmatprep.subr.bf16.mxu1 %v1700_v4 }
 0x1c8   : > { %1703 = vmatpush3.bf16.msra.mxu1 %v1700_v4 }
 0x1c9   : > { %1705 = vmatprep.subr.bf16.mxu1 %v1704_v7 }
 0x1cc   : > { %1707 = vmatpush3.bf16.msra.mxu1 %v1704_v7 }
 0x1cd   : > { %1709 = vmatprep.subr.bf16.mxu1 %v1708_v11 }
 0x1d0   : > { %1711 = vmatpush3.bf16.msra.mxu1 %v1708_v11 }
 0x1d1   : > { %1713 = vmatprep.subr.bf16.mxu1 %v1712_v14 }
 0x1d4   : > { %1715 = vmatpush3.bf16.msra.mxu1 %v1712_v14 }
 0x1d7   : > { %1551 = vmatmul.mubr.f32.vlgmr.msra.gmra.mrb[0].mxu1 %v919_v15 }
 0x2aa   : > { %v1552_v23 = vpop.f32.mrb[0].mxu1 }
 0x2ab   : > { %v1022_v26 = vmul.f32 %v1552_v23, %v1284_v21  ;;  %v1003_v27 = vpop.f32.mrb[1].mxu1 }
 0x2ac   : > { %v1021_v29 = vmul.f32 %v1284_v21, %v1003_v27 }
 0x2ad   : > { %v1031_v30 = vadd.f32 %v1285_v24, %v1022_v26 }
 0x2ae   : > { %v1030_v31 = vadd.f32 %v1285_v24, %v1021_v29 }
 0x2af   : > { %v1140_v32 = vadd.f32 %v1138_v25, %v1031_v30 }
 0x2b0   : > { %v1139_v10 = vadd.f32 %v1137_v28, %v1030_v31 }
 0x2b1   : > { %v1142_v33 = vmax.f32 %v1140_v32, 0.0 }
 0x2b2   : > { %v1141_v34 = vmax.f32 %v1139_v10, 0.0 }
 0x2b3   : > { %1144 = vst [vmem:[%s421_s19 + $0x8] sm:$0xff] %v1142_v33 }
 0x2b4   : > { %1143 = vst [vmem:[%s421_s19] sm:$0xff] %v1141_v34 }
 0x2b5   : > { %1949 = shalt.err (!%p1946_p4)
}
 0x2b6   : > { %s1950_s27 = scalar_lea.hbm %s2344_s24, 256  ;;  %s1954_s19 = scalar_lea.hbm %s2424_s26, 512 }
 0x2b7   : > { %p1951_p9 = scmp.ne.s32.totalorder %s2344_s24, %s1950_s27  ;;  %p1955_p8 = scmp.lt.u32.totalorder %s2344_s24, %s2424_s26 }
 0x2b8   : > { %p1956_p13 = scmp.lt.u32.totalorder %s1954_s19, %s1950_s27  ;;  %p1958_p10 = scmp.lt.u32.totalorder %s1950_s27, %s2344_s24 }
 0x2b9   : > { %p1952_p0 = pnand %p1951_p9, %p2231_p5 }
 0x2ba   : > { %p1957_p6 = por %p1956_p13, %p1955_p8 }
 0x2bb   : > { %p1953_p11 = pneg %p1952_p0 }
 0x2bc   : > { %p1959_p3 = por %p1958_p10, %p1957_p6 }
 0x2be   : > { %p1960_p7 = pnand %p1959_p3, %p1953_p11 }
 0x2c0   : > { %1963 = shalt.err (!%p1960_p7)
}
 0x2c1   : > { %s2020_s29 = smov 128   ;;  %s2021_s12 = smov 8  }
 0x2c2   : > { %1754 = dma.vmem_to_hbm [thread:$0]  (%p2231_p5), %s2339_s21, 256, %s2344_s24, %s1146_s25, %s2020_s29, %s2020_s29, %s2021_s12  }
 0x2c3 PF: > { %s2425_s17 = sld [smem:[#allocation17_spill]]  ;;  %s2426_s18 = sld [smem:[#allocation18_spill]] }
 0x2c4   : > { %p2428_p1 = scmp.ge.s32.totalorder %s2010_s16, 2 }
 0x2c9   : > { %s1174_s28 = sand.u32 1, %s2425_s17   ;;  %p2427_p12 = scmp.ne.s32.totalorder %s2426_s18, 0 }
 0x2ca   : > { %s1175_s27 = scalar_lea.sflag [#allocation6], %s1174_s28 }
 0x2cb   : > { %p1771_p2 = pnand %p2428_p1, %p2427_p12 }
 0x2cd   : > { %1993 = dma.done.wait (!%p1771_p2), %s1175_s27, 256  }
 0x2ce   : > { %1995 = vsyncadd (!%p1771_p2), %s1175_s27, 4294967040  ;;  %s2429_s23 = smov %s2227_s13  ;;  %p25_p4 = scmp.ge.s32.totalorder %s2217_s22, 4  }
 0x2cf   : > { %s2430_s13 = smov %s2002_s14  ;;  %s2431_s14 = smov %s2006_s15 }
 0x2d0   : > { %s2432_s15 = smov %s2429_s23  ;;  %s2433_s16 = smov %s2217_s22 }
 0x2d1   :  { %27 = sbr.rel (!%p25_p4) target bundleno = 10 (0xa), region = 121 }
 0x2d8   :  { %1180 = vsyncpa [#allocation5], 1 }
 0x2d9   :  { %1182 = vsyncpa [#allocation5 + $0x1], 1 }
 0x2da   :  { %1183 = vsyncpa [#allocation8], 1 }
 0x2db   :  { %1184 = vsyncpa [#allocation11], 1 }
 0x2dc   :  { %1185 = vsyncpa [#allocation6], 1 }
 0x2dd   :  { %1187 = vsyncpa [#allocation6 + $0x1], 1 }

</bundles_post_ra>
